<compile_context>
chip_gen: v7x
topology: tpu7x:2x2x1
jax: 0.10.0
libtpu: 0.0.40
codegen_flags: <defaults>
</compile_context>

<pallas_src>
import functools

import jax
import jax.numpy as jnp
import numpy as np
from jax.experimental import pallas as pl
from jax.experimental.pallas import tpu as pltpu


def _round_up(x, m):
    return ((x + m - 1) // m) * m


def _pick_images_per_block(N, Cin, *, sublane_rows=8, min_grid_steps=2):
    """Images per grid step: fill `sublane_rows` f32 sublanes per vreg (batch folding),
    but keep at least `min_grid_steps` parallel grid steps when the batch allows it so
    v7x's second TensorCore is not left idle.  Single-TC v5e/v6e: pass min_grid_steps=1."""
    b_pack = max(1, sublane_rows // max(Cin, 1))
    divisors = [b for b in range(1, N + 1) if N % b == 0]
    cands = [b for b in divisors if b <= b_pack and N // b >= min_grid_steps]
    if cands:
        return max(cands)
    cands = [b for b in divisors if b <= b_pack]
    return max(cands) if cands else 1


def _dsc_kernel(x_ref, dww_ref, pww_ref, pwb_ref, o_ref, *,
                K, W, L, pad_lanes, Cin, Cout, Bblk, use_mxu):
    """Fused depthwise (KxK, groups=Cin) + pointwise (1x1) conv for Bblk images.

    x_ref   : (1, Bblk*Cin, L)   flattened images, spatial on lanes (L % 128 == 0)
    dww_ref : (Bblk*Cin, K*K)    per-row depthwise weights (channel pattern tiled over Bblk)
    pww_ref : (Cout, Cin)        pointwise weights
    pwb_ref : (Cout, 1)          pointwise bias with the depthwise bias folded in
    o_ref   : (1, Bblk*Cout, L)  flattened outputs, spatial on lanes (unmasked store)
    """
    # Load once; f32 compute.  (For a bf16 model on v6e/v7x the depthwise stage could stay
    # in bf16 — kept f32 here since the test dtype is f32 and v5e has no bf16 VPU.)
    x = x_ref[0].astype(jnp.float32)            # (Bblk*Cin, L)
    dww = dww_ref[...].astype(jnp.float32)      # (Bblk*Cin, K*K) -- hoisted out of the tap loop
    pww = pww_ref[...].astype(jnp.float32)      # (Cout, Cin)
    pwb = pwb_ref[...].astype(jnp.float32)      # (Cout, 1)

    # In-kernel zero tail (no HBM traffic) so every tap slice below stays in bounds.  The
    # tail only feeds output lanes that are sliced away in the wrapper.
    xp = jnp.concatenate(
        [x, jnp.zeros((x.shape[0], pad_lanes), dtype=x.dtype)], axis=1)

    # ---- depthwise KxK: 9 lane-shifted slices * per-row scalar columns (VPU MACs; the lane
    # shifts are in-vreg relayouts that co-issue on the XLU slot) ------------------------------
    acc = xp[:, 0:L] * dww[:, 0:1]              # tap (0,0), aligned
    for t in range(1, K * K):
        kh, kw = divmod(t, K)
        off = kh * W + kw                       # flat-index shift of tap (kh, kw)
        acc = acc + xp[:, off:off + L] * dww[:, t:t + 1]
    # (depthwise bias is folded into pwb -> no add here)

    # ---- pointwise 1x1 per image in the block -------------------------------------------------
    parts = []
    for b in range(Bblk):
        a = acc[b * Cin:(b + 1) * Cin, :]       # (Cin, L)
        if use_mxu:
            # Realistic channel counts: one MXU matmul per image.
            out_b = jnp.dot(pww, a, preferred_element_type=jnp.float32)
        else:
            # Toy channel counts: Cin broadcast-MACs on the VPU, spatial stays on lanes.
            out_b = pww[:, 0:1] * a[0:1, :]
            for ci in range(1, Cin):
                out_b = out_b + pww[:, ci:ci + 1] * a[ci:ci + 1, :]
        parts.append(out_b + pwb)               # (Cout, L)

    out = parts[0] if Bblk == 1 else jnp.concatenate(parts, axis=0)
    o_ref[0] = out.astype(o_ref.dtype)          # single unmasked lane-dense store


def depthwise_separable_conv(x_nchw, dw_weight, dw_bias, pw_weight, pw_bias,
                             *, kernel_size=3, stride=1, padding=0, min_grid_steps=2):
    """x_nchw: (N, Cin, H, W). dw_weight: (Cin, 1, K, K). pw_weight: (Cout, Cin, 1, 1)."""
    assert stride == 1 and padding == 0, "matches the nn.Module defaults"
    N, Cin, H, W = x_nchw.shape
    Cout = pw_weight.shape[0]
    K = kernel_size
    H_out, W_out = H - K + 1, W - K + 1
    HW = H * W
    HWp = _round_up(HW, 128)                     # lane-dense width (no pad emitted if HW%128==0)

    Bblk = _pick_images_per_block(N, Cin, min_grid_steps=min_grid_steps)
    G = N // Bblk                                # grid steps (batch groups)
    R_in, R_out = Bblk * Cin, Bblk * Cout

    # Plain-JAX glue (all free reshapes; no HBM pad pass at these shapes).
    x_rows = x_nchw.reshape(N * Cin, HW)
    if HWp != HW:                                # only when H*W is not already lane-aligned
        x_rows = jnp.pad(x_rows, ((0, 0), (0, HWp - HW)))
    x_blk = x_rows.reshape(G, R_in, HWp)

    dww = jnp.tile(dw_weight.reshape(Cin, K * K), (Bblk, 1))      # (R_in, K*K)
    pww = pw_weight.reshape(Cout, Cin)
    # Fold the depthwise bias:  pw(dw(x) + b_dw) + b_pw  ==  pw(dw(x)) + (b_pw + pww @ b_dw)
    pwb_eff = (pw_bias + pww @ dw_bias).reshape(Cout, 1)

    max_off = (K - 1) * W + (K - 1)              # largest flat-index tap shift
    pad_lanes = _round_up(max_off, 128)          # in-kernel zero tail size
    use_mxu = min(Cin, Cout) >= 32               # MXU pointwise only at non-toy channel counts

    # Size VMEM limit from the actual (double-buffered) block bytes, with margin; cap at v7x's
    # 64 MiB physical VMEM.
    itemsize = jnp.dtype(x_nchw.dtype).itemsize
    io_bytes = (R_in + R_out) * HWp * itemsize
    vmem_limit = int(min(64 * 2**20, max(16 * 2**20, 8 * io_bytes)))

    kernel = functools.partial(_dsc_kernel, K=K, W=W, L=HWp, pad_lanes=pad_lanes,
                               Cin=Cin, Cout=Cout, Bblk=Bblk, use_mxu=use_mxu)

    out_blk = pl.pallas_call(
        kernel,
        out_shape=jax.ShapeDtypeStruct((G, R_out, HWp), x_nchw.dtype),
        grid_spec=pltpu.PrefetchScalarGridSpec(
            num_scalar_prefetch=0,
            grid=(G,),
            in_specs=[
                pl.BlockSpec((1, R_in, HWp), lambda g: (g, 0, 0)),
                pl.BlockSpec((R_in, K * K), lambda g: (0, 0)),
                pl.BlockSpec((Cout, Cin), lambda g: (0, 0)),
                pl.BlockSpec((Cout, 1), lambda g: (0, 0)),
            ],
            out_specs=pl.BlockSpec((1, R_out, HWp), lambda g: (g, 0, 0)),
        ),
        compiler_params=pltpu.CompilerParams(
            dimension_semantics=("parallel",),
            vmem_limit_bytes=vmem_limit,
        ),
    )(x_blk, dww, pww, pwb_eff)

    # Back to the exact valid NCHW region the nn.Module returns (skip if the consumer can take
    # the padded flat layout).
    out = out_blk.reshape(N, Cout, HWp)[:, :, :HW].reshape(N, Cout, H, W)
    return out[:, :, :H_out, :W_out]


def _reference(x, dw_weight, dw_bias, pw_weight, pw_bias):
    """Plain-JAX NCHW reference matching torch semantics (groups=nin depthwise, then 1x1)."""
    nin = x.shape[1]
    dw = jax.lax.conv_general_dilated(
        x, dw_weight, window_strides=(1, 1), padding="VALID",
        dimension_numbers=("NCHW", "OIHW", "NCHW"), feature_group_count=nin)
    dw = dw + dw_bias[None, :, None, None]
    pw = jax.lax.conv_general_dilated(
        dw, pw_weight, window_strides=(1, 1), padding="VALID",
        dimension_numbers=("NCHW", "OIHW", "NCHW"))
    return pw + pw_bias[None, :, None, None]


if __name__ == "__main__":
    # Small deterministic setup: N=2, nin=4, nout=8, spatial 16x16, kernel 3.
    N, nin, nout, H, W, K = 2, 4, 8, 16, 16, 3
    key = jax.random.PRNGKey(0)
    kx, k1, k2, k3, k4 = jax.random.split(key, 5)

    x = jax.random.normal(kx, (N, nin, H, W), dtype=jnp.float32)
    dw_weight = 0.1 * jax.random.normal(k1, (nin, 1, K, K), dtype=jnp.float32)   # groups=nin
    dw_bias = 0.1 * jax.random.normal(k2, (nin,), dtype=jnp.float32)
    pw_weight = 0.1 * jax.random.normal(k3, (nout, nin, 1, 1), dtype=jnp.float32)
    pw_bias = 0.1 * jax.random.normal(k4, (nout,), dtype=jnp.float32)

    out = depthwise_separable_conv(x, dw_weight, dw_bias, pw_weight, pw_bias,
                                   kernel_size=K, stride=1, padding=0)
    out = jax.block_until_ready(out)

    ref = jax.block_until_ready(_reference(x, dw_weight, dw_bias, pw_weight, pw_bias))

    assert out.shape == (N, nout, H - K + 1, W - K + 1), out.shape
    np.testing.assert_allclose(np.asarray(out), np.asarray(ref), atol=1e-4, rtol=1e-4)
    print("KERNEL_OK")
</pallas_src>

<mosaic_0001>
module attributes {stable_mosaic.version = 11 : i64} {
  func.func @_dsc_kernel(%arg0: i32, %arg1: memref<1x4x256xf32, #tpu.memory_space<vmem>>, %arg2: memref<4x9xf32, #tpu.memory_space<vmem>>, %arg3: memref<8x4xf32, #tpu.memory_space<vmem>>, %arg4: memref<8x1xf32, #tpu.memory_space<vmem>>, %arg5: memref<1x8x256xf32, #tpu.memory_space<vmem>>) attributes {dimension_semantics = [#tpu.dimension_semantics<parallel>], iteration_bounds = array<i64: 2>, scalar_prefetch = 0 : i64, scratch_operands = 0 : i64, tpu.core_type = #tpu.core_type<tc>, window_params = [{transform_indices = @transform_0, window_bounds = array<i64: 1, 4, 256>}, {pipeline_mode = #tpu.pipeline_mode<synchronous>, transform_indices = @transform_1, window_bounds = array<i64: 4, 9>}, {pipeline_mode = #tpu.pipeline_mode<synchronous>, transform_indices = @transform_2, window_bounds = array<i64: 8, 4>}, {pipeline_mode = #tpu.pipeline_mode<synchronous>, transform_indices = @transform_3, window_bounds = array<i64: 8, 1>}, {transform_indices = @transform_4, window_bounds = array<i64: 1, 8, 256>}]} {
    %c0 = arith.constant 0 : index
    %c0_0 = arith.constant 0 : index
    %c0_1 = arith.constant 0 : index
    %0 = vector.load %arg1[%c0, %c0_0, %c0_1] : memref<1x4x256xf32, #tpu.memory_space<vmem>>, vector<1x4x256xf32>
    %1 = vector.shape_cast %0 : vector<1x4x256xf32> to vector<4x256xf32>
    %c0_2 = arith.constant 0 : index
    %c0_3 = arith.constant 0 : index
    %2 = vector.load %arg2[%c0_2, %c0_3] : memref<4x9xf32, #tpu.memory_space<vmem>>, vector<4x9xf32>
    %c0_4 = arith.constant 0 : index
    %c0_5 = arith.constant 0 : index
    %3 = vector.load %arg3[%c0_4, %c0_5] : memref<8x4xf32, #tpu.memory_space<vmem>>, vector<8x4xf32>
    %c0_6 = arith.constant 0 : index
    %c0_7 = arith.constant 0 : index
    %4 = vector.load %arg4[%c0_6, %c0_7] : memref<8x1xf32, #tpu.memory_space<vmem>>, vector<8x1xf32>
    %cst = arith.constant 0.000000e+00 : f32
    %5 = vector.broadcast %cst : f32 to vector<4x128xf32>
    %6 = tpu.concatenate %1, %5 in 1 : vector<4x256xf32>, vector<4x128xf32> -> vector<4x384xf32>
    %7 = vector.extract_strided_slice %6 {offsets = [0, 0], sizes = [4, 256], strides = [1, 1]} : vector<4x384xf32> to vector<4x256xf32>
    %8 = vector.extract_strided_slice %2 {offsets = [0, 0], sizes = [4, 1], strides = [1, 1]} : vector<4x9xf32> to vector<4x1xf32>
    %9 = vector.broadcast %8 : vector<4x1xf32> to vector<4x256xf32>
    %10 = arith.mulf %7, %9 : vector<4x256xf32>
    %11 = vector.extract_strided_slice %6 {offsets = [0, 1], sizes = [4, 256], strides = [1, 1]} : vector<4x384xf32> to vector<4x256xf32>
    %12 = vector.extract_strided_slice %2 {offsets = [0, 1], sizes = [4, 1], strides = [1, 1]} : vector<4x9xf32> to vector<4x1xf32>
    %13 = vector.broadcast %12 : vector<4x1xf32> to vector<4x256xf32>
    %14 = arith.mulf %11, %13 : vector<4x256xf32>
    %15 = arith.addf %10, %14 : vector<4x256xf32>
    %16 = vector.extract_strided_slice %6 {offsets = [0, 2], sizes = [4, 256], strides = [1, 1]} : vector<4x384xf32> to vector<4x256xf32>
    %17 = vector.extract_strided_slice %2 {offsets = [0, 2], sizes = [4, 1], strides = [1, 1]} : vector<4x9xf32> to vector<4x1xf32>
    %18 = vector.broadcast %17 : vector<4x1xf32> to vector<4x256xf32>
    %19 = arith.mulf %16, %18 : vector<4x256xf32>
    %20 = arith.addf %15, %19 : vector<4x256xf32>
    %21 = vector.extract_strided_slice %6 {offsets = [0, 16], sizes = [4, 256], strides = [1, 1]} : vector<4x384xf32> to vector<4x256xf32>
    %22 = vector.extract_strided_slice %2 {offsets = [0, 3], sizes = [4, 1], strides = [1, 1]} : vector<4x9xf32> to vector<4x1xf32>
    %23 = vector.broadcast %22 : vector<4x1xf32> to vector<4x256xf32>
    %24 = arith.mulf %21, %23 : vector<4x256xf32>
    %25 = arith.addf %20, %24 : vector<4x256xf32>
    %26 = vector.extract_strided_slice %6 {offsets = [0, 17], sizes = [4, 256], strides = [1, 1]} : vector<4x384xf32> to vector<4x256xf32>
    %27 = vector.extract_strided_slice %2 {offsets = [0, 4], sizes = [4, 1], strides = [1, 1]} : vector<4x9xf32> to vector<4x1xf32>
    %28 = vector.broadcast %27 : vector<4x1xf32> to vector<4x256xf32>
    %29 = arith.mulf %26, %28 : vector<4x256xf32>
    %30 = arith.addf %25, %29 : vector<4x256xf32>
    %31 = vector.extract_strided_slice %6 {offsets = [0, 18], sizes = [4, 256], strides = [1, 1]} : vector<4x384xf32> to vector<4x256xf32>
    %32 = vector.extract_strided_slice %2 {offsets = [0, 5], sizes = [4, 1], strides = [1, 1]} : vector<4x9xf32> to vector<4x1xf32>
    %33 = vector.broadcast %32 : vector<4x1xf32> to vector<4x256xf32>
    %34 = arith.mulf %31, %33 : vector<4x256xf32>
    %35 = arith.addf %30, %34 : vector<4x256xf32>
    %36 = vector.extract_strided_slice %6 {offsets = [0, 32], sizes = [4, 256], strides = [1, 1]} : vector<4x384xf32> to vector<4x256xf32>
    %37 = vector.extract_strided_slice %2 {offsets = [0, 6], sizes = [4, 1], strides = [1, 1]} : vector<4x9xf32> to vector<4x1xf32>
    %38 = vector.broadcast %37 : vector<4x1xf32> to vector<4x256xf32>
    %39 = arith.mulf %36, %38 : vector<4x256xf32>
    %40 = arith.addf %35, %39 : vector<4x256xf32>
    %41 = vector.extract_strided_slice %6 {offsets = [0, 33], sizes = [4, 256], strides = [1, 1]} : vector<4x384xf32> to vector<4x256xf32>
    %42 = vector.extract_strided_slice %2 {offsets = [0, 7], sizes = [4, 1], strides = [1, 1]} : vector<4x9xf32> to vector<4x1xf32>
    %43 = vector.broadcast %42 : vector<4x1xf32> to vector<4x256xf32>
    %44 = arith.mulf %41, %43 : vector<4x256xf32>
    %45 = arith.addf %40, %44 : vector<4x256xf32>
    %46 = vector.extract_strided_slice %6 {offsets = [0, 34], sizes = [4, 256], strides = [1, 1]} : vector<4x384xf32> to vector<4x256xf32>
    %47 = vector.extract_strided_slice %2 {offsets = [0, 8], sizes = [4, 1], strides = [1, 1]} : vector<4x9xf32> to vector<4x1xf32>
    %48 = vector.broadcast %47 : vector<4x1xf32> to vector<4x256xf32>
    %49 = arith.mulf %46, %48 : vector<4x256xf32>
    %50 = arith.addf %45, %49 : vector<4x256xf32>
    %51 = vector.extract_strided_slice %3 {offsets = [0, 0], sizes = [8, 1], strides = [1, 1]} : vector<8x4xf32> to vector<8x1xf32>
    %52 = vector.extract_strided_slice %50 {offsets = [0, 0], sizes = [1, 256], strides = [1, 1]} : vector<4x256xf32> to vector<1x256xf32>
    %53 = vector.broadcast %51 : vector<8x1xf32> to vector<8x256xf32>
    %54 = vector.broadcast %52 : vector<1x256xf32> to vector<8x256xf32>
    %55 = arith.mulf %53, %54 : vector<8x256xf32>
    %56 = vector.extract_strided_slice %3 {offsets = [0, 1], sizes = [8, 1], strides = [1, 1]} : vector<8x4xf32> to vector<8x1xf32>
    %57 = vector.extract_strided_slice %50 {offsets = [1, 0], sizes = [1, 256], strides = [1, 1]} : vector<4x256xf32> to vector<1x256xf32>
    %58 = vector.broadcast %56 : vector<8x1xf32> to vector<8x256xf32>
    %59 = vector.broadcast %57 : vector<1x256xf32> to vector<8x256xf32>
    %60 = arith.mulf %58, %59 : vector<8x256xf32>
    %61 = arith.addf %55, %60 : vector<8x256xf32>
    %62 = vector.extract_strided_slice %3 {offsets = [0, 2], sizes = [8, 1], strides = [1, 1]} : vector<8x4xf32> to vector<8x1xf32>
    %63 = vector.extract_strided_slice %50 {offsets = [2, 0], sizes = [1, 256], strides = [1, 1]} : vector<4x256xf32> to vector<1x256xf32>
    %64 = vector.broadcast %62 : vector<8x1xf32> to vector<8x256xf32>
    %65 = vector.broadcast %63 : vector<1x256xf32> to vector<8x256xf32>
    %66 = arith.mulf %64, %65 : vector<8x256xf32>
    %67 = arith.addf %61, %66 : vector<8x256xf32>
    %68 = vector.extract_strided_slice %3 {offsets = [0, 3], sizes = [8, 1], strides = [1, 1]} : vector<8x4xf32> to vector<8x1xf32>
    %69 = vector.extract_strided_slice %50 {offsets = [3, 0], sizes = [1, 256], strides = [1, 1]} : vector<4x256xf32> to vector<1x256xf32>
    %70 = vector.broadcast %68 : vector<8x1xf32> to vector<8x256xf32>
    %71 = vector.broadcast %69 : vector<1x256xf32> to vector<8x256xf32>
    %72 = arith.mulf %70, %71 : vector<8x256xf32>
    %73 = arith.addf %67, %72 : vector<8x256xf32>
    %74 = vector.broadcast %4 : vector<8x1xf32> to vector<8x256xf32>
    %75 = arith.addf %73, %74 : vector<8x256xf32>
    %c0_8 = arith.constant 0 : index
    %c0_9 = arith.constant 0 : index
    %c0_10 = arith.constant 0 : index
    %76 = vector.load %arg5[%c0_8, %c0_9, %c0_10] : memref<1x8x256xf32, #tpu.memory_space<vmem>>, vector<1x8x256xf32>
    %77 = vector.shape_cast %76 : vector<1x8x256xf32> to vector<8x256xf32>
    %78 = vector.shape_cast %75 : vector<8x256xf32> to vector<1x8x256xf32>
    tpu.vector_store %arg5[%c0_8, %c0_9, %c0_10], %78 {strides = array<i32>} : memref<1x8x256xf32, #tpu.memory_space<vmem>>, vector<1x8x256xf32>,
    return
  }
  func.func @transform_0(%arg0: i32) -> (i32, i32, i32) {
    %c0_i32 = arith.constant 0 : i32
    %c0_i32_0 = arith.constant 0 : i32
    %c0_i32_1 = arith.constant 0 : i32
    return %arg0, %c0_i32, %c0_i32_0 : i32, i32, i32
  }
  func.func @transform_1(%arg0: i32) -> (i32, i32) {
    %c0_i32 = arith.constant 0 : i32
    %c0_i32_0 = arith.constant 0 : i32
    %c0_i32_1 = arith.constant 0 : i32
    return %c0_i32, %c0_i32_0 : i32, i32
  }
  func.func @transform_2(%arg0: i32) -> (i32, i32) {
    %c0_i32 = arith.constant 0 : i32
    %c0_i32_0 = arith.constant 0 : i32
    %c0_i32_1 = arith.constant 0 : i32
    return %c0_i32, %c0_i32_0 : i32, i32
  }
  func.func @transform_3(%arg0: i32) -> (i32, i32) {
    %c0_i32 = arith.constant 0 : i32
    %c0_i32_0 = arith.constant 0 : i32
    %c0_i32_1 = arith.constant 0 : i32
    return %c0_i32, %c0_i32_0 : i32, i32
  }
  func.func @transform_4(%arg0: i32) -> (i32, i32, i32) {
    %c0_i32 = arith.constant 0 : i32
    %c0_i32_0 = arith.constant 0 : i32
    %c0_i32_1 = arith.constant 0 : i32
    return %arg0, %c0_i32, %c0_i32_0 : i32, i32, i32
  }
}

</mosaic_0001>

<bundles_post_ra>
// kernel: tpu_custom_call.1
= control target key start
LH: loop header
LB: loop body
LE: loop exit
PB: predicated region body
PF: predicated region fallthrough
CT: control target
= control target key end

     0   :  { %9 = vsyncpa [#allocation3], 0  ;;  %s888_s0 = inlined_call_operand.vmem [shape: f32[2,4,256], index: 0, kind: input, shape index: {}]   ;;  %s889_s1 = inlined_call_operand.vmem [shape: f32[4,9], index: 1, kind: input, shape index: {}]   ;;  %s890_s2 = inlined_call_operand.vmem [shape: f32[8,4], index: 2, kind: input, shape index: {}]   ;;  %s891_s3 = inlined_call_operand.vmem [shape: f32[8,1], index: 3, kind: input, shape index: {}]   ;;  %s892_s4 = inlined_call_operand.hbm [shape: f32[2,8,256], index: 4, kind: output, shape index: {}]  }
   0x1   :  { %11 = vsyncpa [#allocation3 + $0x1], 0  ;;  %s733_s15 = smov 0   ;;  %s735_s16 = smov 0  }
   0x2   :  { %s737_s17 = smov 0   ;;  %s739_s18 = smov 0  }
   0x3 LB: > { %s754_s19 = sadd.s32 4294967295, %s688_s18   ;;  %s540_s20 = sadd.s32 4294967294, %s688_s18   ;;  %s688_s18 = sphi %s739_s18, %s898_s18   ;;  %s684_s17 = sphi %s737_s17, %s897_s17   ;;  %s680_s16 = sphi %s735_s16, %s896_s16   ;;  %s676_s15 = sphi %s733_s15, %s895_s15  }
   0x4   : > { %s758_s21 = sadd.s32 1, %s688_s18   ;;  %s113_s22 = sadd.s32 1, %s684_s17 }
   0x5   : > { %s110_s23 = ssub.s32 %s688_s18, %s758_s21  ;;  %p123_p0 = scmp.ne.s32.totalorder %s684_s17, %s680_s16 }
   0x6   : > { %p111_p1 = scmp.eq.s32.totalorder %s110_s23, 0  ;;  %p124_p2 = scmp.eq.s32.totalorder %s754_s19, 1 }
   0x7   : > { %p129_p3 = scmp.ne.s32.totalorder %s680_s16, %s676_s15  ;;  %p130_p4 = scmp.eq.s32.totalorder %s540_s20, 1 }
   0x8   : > { %s769_s24 = scalar_select %p111_p1, %s684_s17, %s113_s22  }
   0x9   : > { %p771_p5 = por %p124_p2, %p123_p0  ;;  %p775_p6 = por %p130_p4, %p129_p3 }
   0xa   : > { %p543_p7 = scmp.ge.s32.totalorder %s688_s18, 1  ;;  %p165_p8 = scmp.lt.s32.totalorder %s688_s18, 3 }
   0xc   : > { %p166_p9 = pnand %p543_p7, %p165_p8 }
   0xd   : > { %v197_v0 = vld [vmem:[%s889_s1] sm:$0xf] (!%p166_p9)  ;;  %v690_v1 = vmov (!%p166_p9), 1   ;;  %v691_v2 = vmov (!%p166_p9), 3   ;;  %v692_v3 = vmov (!%p166_p9), 2   ;;  %v693_v4 = vmov (!%p166_p9), 4  }
   0xe   : > { %169 = sbr.rel (%p166_p9) target bundleno = 347 (0x15b), region = 36  ;;  %610 = vset.pattern.permute.xlu0 (!%p166_p9), %v690_v1  ;;  %612 = vset.pattern.permute.xlu1 (!%p166_p9), %v691_v2  ;;  %v694_v5 = vmov (!%p166_p9), 5   ;;  %v695_v6 = vmov (!%p166_p9), 6   ;;  %v696_v7 = vmov (!%p166_p9), 7   ;;  %v697_v8 = vmov (!%p166_p9), 0   ;;  %v788_v9 = vld [vmem:[%s890_s2] sm:$0xff] (!%p166_p9) }
   0xf   : > { %211 = vperm.xlu0 (!%p166_p9), %610, %v197_v0   ;;  %257 = vperm.xlu1 (!%p166_p9), %612, %v197_v0   ;;  %v698_v10 = vmov (!%p166_p9), 8   ;;  %p191_p10 = scmp.lt.s32.totalorder (!%p166_p9), %s754_s19, 1  ;;  %s699_s10 = smov (!%p166_p9), 127   ;;  %v199_v45 = vld [vmem:[%s891_s3] sm:$0xff] (!%p166_p9)  ;;  %vm226_vm0 = vcmask (!%p166_p9), 1039360   ;;  %vm249_vm1 = vcmask (!%p166_p9), 1031168  }
  0x10   : > { %s700_s11 = smov (!%p166_p9), 126   ;;  %s701_s12 = smov (!%p166_p9), 112   ;;  %vm272_vm2 = vcmask (!%p166_p9), 916480   ;;  %vm295_vm3 = vcmask (!%p166_p9), 908288   ;;  %vm318_vm4 = vcmask (!%p166_p9), 900096   ;;  %vm341_vm5 = vcmask (!%p166_p9), 785408  }
  0x11   : > { %s702_s13 = smov (!%p166_p9), 111   ;;  %s703_s14 = smov (!%p166_p9), 110   ;;  %vm364_vm6 = vcmask (!%p166_p9), 777216   ;;  %vm387_vm7 = vcmask (!%p166_p9), 769024  }
  0x12   : > { %s704_s20 = smov (!%p166_p9), 96   ;;  %s705_s22 = smov (!%p166_p9), 95  }
  0x13   : > { %611 = vset.pattern.permute.xlu0 (!%p166_p9), %v692_v3  ;;  %613 = vset.pattern.permute.xlu1 (!%p166_p9), %v693_v4  ;;  %s706_s23 = smov (!%p166_p9), 94   ;;  %s188_s29 = sand.u32 (!%p166_p9), 1, %s680_s16  }
  0x14   : > { %234 = vperm.xlu0 (!%p166_p9), %611, %v197_v0   ;;  %280 = vperm.xlu1 (!%p166_p9), %613, %v197_v0   ;;  %s544_s30 = sshll.u32 (!%p166_p9), %s188_s29, 4 }
  0x15   : > { %s192_s5 = scalar_select %p191_p10, %s754_s19, 1 }
  0x17   : > { %s552_s6 = sshll.u32 %s192_s5, 3  ;;  %s553_s5 = sshll.u32 %s754_s19, 8 }
  0x18   : > { %614 = vset.pattern.permute.xlu1 %v694_v5  ;;  %615 = vset.pattern.permute.xlu0 %v695_v6  ;;  %s195_s9 = scalar_lea.vmem %s888_s0, %s552_s6  ;;  %s190_s6 = scalar_lea.vmem [#allocation2], %s544_s30 }
  0x19   : > { %303 = vperm.xlu1 %614, %v197_v0   ;;  %326 = vperm.xlu0 %615, %v197_v0   ;;  %v798_v11 = vld [vmem:[%s195_s9] sm:$0xff]  ;;  %s481_s7 = sshll.u32 %s190_s6, 4  ;;  %s467_s19 = scalar_lea.sflag [#allocation3], %s188_s29  ;;  %s846_s7 = int_to_ptr.vmem [resolvable:$true] %s481_s7 }
  0x1a   : > { %v802_v13 = vcombine.high %v798_v11, %v798_v11 }
  0x1d   : > { %616 = vset.pattern.permute.xlu1 %v696_v7  ;;  %618 = vset.pattern.permute.xlu0 %v697_v8 }
  0x1e   : > { %349 = vperm.xlu1 %616, %v197_v0   ;;  %205 = vperm.xlu0 %618, %v197_v0  }
  0x22   : > { %617 = vset.pattern.permute.xlu1 %v698_v10  ;;  %620 = vset.pattern.permute.xlu0 %v690_v1 }
  0x23   : > { %372 = vperm.xlu1 %617, %v197_v0   ;;  %410 = vperm.xlu0 %620, %v788_v9  }
  0x27   : > { %619 = vset.pattern.permute.xlu1 %v697_v8  ;;  %622 = vset.pattern.permute.xlu0 %v691_v2 }
  0x28   : > { %396 = vperm.xlu1 %619, %v788_v9  }
  0x2c   : > { %621 = vset.pattern.permute.xlu1 %v692_v3 }
  0x8e   : > { %v212_v12 = vpop.permute.xlu0 %211  ;;  %v258_v18 = vpop.permute.xlu1 %257 }
  0x8f   : > { %v214_v14 = vmul.f32 %v212_v12, %v798_v11  ;;  %v216_v15 = vmul.f32 0.0, %v212_v12  ;;  %v215_v16 = vmul.f32 %v212_v12, %v802_v13  ;;  %v260_v21 = vmul.f32 %v258_v18, %v798_v11 }
  0x90   : > { %v262_v23 = vmul.f32 0.0, %v258_v18  ;;  %v261_v25 = vmul.f32 %v258_v18, %v802_v13 }
  0x91   : > { %224 = vrot.lane.b32.xlu0 %v216_v15, %s699_s10  ;;  %220 = vrot.lane.b32.xlu1 %v214_v14, %s699_s10 }
  0x93   : > { %v235_v17 = vpop.permute.xlu0 %234  ;;  %v281_v22 = vpop.permute.xlu1 %280 }
  0x94   : > { %v238_v19 = vmul.f32 %v235_v17, %v802_v13  ;;  %v237_v20 = vmul.f32 %v235_v17, %v798_v11  ;;  %v239_v24 = vmul.f32 0.0, %v235_v17  ;;  %v284_v26 = vmul.f32 %v281_v22, %v802_v13 }
  0x95   : > { %222 = vrot.lane.b32.xlu1 %v215_v16, %s699_s10  ;;  %v283_v28 = vmul.f32 %v281_v22, %v798_v11  ;;  %v285_v31 = vmul.f32 0.0, %v281_v22  ;;  %s844_s10 = scalar_lea.hbm %s892_s4, %s553_s5 }
  0x96   : > { %245 = vrot.lane.b32.xlu0 %v238_v19, %s700_s11 }
  0x98   : > { %v304_v27 = vpop.permute.xlu1 %303  ;;  %v327_v32 = vpop.permute.xlu0 %326 }
  0x99   : > { %243 = vrot.lane.b32.xlu1 %v237_v20, %s700_s11  ;;  %v306_v29 = vmul.f32 %v304_v27, %v798_v11  ;;  %v308_v30 = vmul.f32 0.0, %v304_v27  ;;  %v307_v33 = vmul.f32 %v304_v27, %v802_v13  ;;  %v330_v34 = vmul.f32 %v327_v32, %v802_v13 }
  0x9a   : > { %266 = vrot.lane.b32.xlu0 %v260_v21, %s701_s12  ;;  %v329_v36 = vmul.f32 %v327_v32, %v798_v11  ;;  %v331_v39 = vmul.f32 0.0, %v327_v32  ;;  %v399_v27 = vlaneseq }
  0x9d   : > { %247 = vrot.lane.b32.xlu1 %v239_v24, %s700_s11  ;;  %v350_v35 = vpop.permute.xlu1 %349  ;;  %v206_v46 = vpop.permute.xlu0 %205  ;;  %s626_s11 = scalar_lea.vmem %s846_s7, 256 }
  0x9e   : > { %270 = vrot.lane.b32.xlu0 %v262_v23, %s701_s12  ;;  %v352_v37 = vmul.f32 %v350_v35, %v798_v11  ;;  %v354_v38 = vmul.f32 0.0, %v350_v35  ;;  %v353_v41 = vmul.f32 %v350_v35, %v802_v13  ;;  %v208_v2 = vmul.f32 %v206_v46, %v798_v11  ;;  %p627_p11 = scmp.ne.s32.totalorder %s846_s7, %s626_s11 }
  0x9f   : > { %v209_v3 = vmul.f32 %v206_v46, %v802_v13 }
  0xa0   : > { %p628_p12 = pnand %p627_p11, %p771_p5 }
  0xa1   : > { %268 = vrot.lane.b32.xlu1 %v261_v25, %s701_s12  ;;  %s707_s12 = smov [#allocation2]  }
  0xa2   : > { %291 = vrot.lane.b32.xlu0 %v284_v26, %s702_s13  ;;  %v373_v40 = vpop.permute.xlu1 %372  ;;  %v829_v48 = vpop.permute.xlu0 %410  ;;  %p629_p13 = pneg %p628_p12 }
  0xa3   : > { %v377_v42 = vmul.f32 0.0, %v373_v40  ;;  %v375_v43 = vmul.f32 %v373_v40, %v798_v11  ;;  %v376_v44 = vmul.f32 %v373_v40, %v802_v13 }
  0xa5   : > { %289 = vrot.lane.b32.xlu1 %v283_v28, %s702_s13 }
  0xa6   : > { %312 = vrot.lane.b32.xlu0 %v306_v29, %s703_s14 }
  0xa7   : > { %v827_v47 = vpop.permute.xlu1 %396 }
  0xa9   : > { %293 = vrot.lane.b32.xlu1 %v285_v31, %s702_s13  ;;  %s630_s13 = sshll.u32 %s707_s12, 4  ;;  %s631_s13 = int_to_ptr.vmem [resolvable:$false] %s630_s13 }
  0xaa   : > { %316 = vrot.lane.b32.xlu0 %v308_v30, %s703_s14  ;;  %p633_p0 = scmp.lt.s32.totalorder %s846_s7, %s631_s13 }
  0xad   : > { %314 = vrot.lane.b32.xlu1 %v307_v33, %s703_s14  ;;  %s632_s14 = scalar_lea.vmem %s631_s13, 512 }
  0xae   : > { %337 = vrot.lane.b32.xlu0 %v330_v34, %s704_s20  ;;  %p634_p1 = scmp.lt.s32.totalorder %s632_s14, %s626_s11 }
  0xb0   : > { %p635_p2 = por %p634_p1, %p633_p0 }
  0xb1   : > { %335 = vrot.lane.b32.xlu1 %v329_v36, %s704_s20 }
  0xb2   : > { %358 = vrot.lane.b32.xlu0 %v352_v37, %s705_s22  ;;  %p636_p3 = pnand %p635_p2, %p629_p13 }
  0xb5   : > { %339 = vrot.lane.b32.xlu1 %v331_v39, %s704_s20 }
  0xb6   : > { %362 = vrot.lane.b32.xlu0 %v354_v38, %s705_s22  ;;  %v400_v38 = vshrl.u32 %v399_v27, 7 }
  0xb8   : > { %v415_v46 = vsub.s32 1, %v400_v38 }
  0xb9   : > { %360 = vrot.lane.b32.xlu1 %v353_v41, %s705_s22 }
  0xba   : > { %385 = vrot.lane.b32.xlu0 %v377_v42, %s706_s23 }
  0xbd   : > { %381 = vrot.lane.b32.xlu1 %v375_v43, %s706_s23 }
  0xbe   : > { %442 = vperm.xlu0 %622, %v788_v9  }
  0xc1   : > { %383 = vrot.lane.b32.xlu1 %v376_v44, %s706_s23 }
  0xc2   : > { %624 = vset.pattern.permute.xlu0 %v697_v8 }
  0xc5   : > { %426 = vperm.xlu1 %621, %v788_v9  }
  0xc9   : > { %623 = vset.pattern.permute.xlu1 %v697_v8 }
  0xca   : > { %459 = vperm.xlu1 %623, %v199_v45   ;;  %v401_v45 = vsub.s32 0, %v400_v38 }
 0x103   : > { %v221_v49 = vpop.permute.xlu1 %220  ;;  %v225_v50 = vpop.permute.xlu0 %224 }
 0x107   : > { %v223_v51 = vpop.permute.xlu1 %222 }
 0x108   : > { %v246_v52 = vpop.permute.xlu0 %245  ;;  %v227_v5 = vsel %vm226_vm0, %v221_v49, %v223_v51  ;;  %v228_v6 = vsel %vm226_vm0, %v223_v51, %v225_v50 }
 0x109   : > { %v231_v10 = vadd.f32 %v227_v5, %v208_v2  ;;  %v232_v12 = vadd.f32 %v228_v6, %v209_v3 }
 0x10b   : > { %v244_v53 = vpop.permute.xlu1 %243 }
 0x10c   : > { %v267_v54 = vpop.permute.xlu0 %266  ;;  %v250_v8 = vsel %vm249_vm1, %v244_v53, %v246_v52  ;;  %v431_v53 = vsub.s32 2, %v400_v38 }
 0x10d   : > { %v254_v17 = vadd.f32 %v250_v8, %v231_v10 }
 0x10f   : > { %v248_v55 = vpop.permute.xlu1 %247 }
 0x110   : > { %v271_v56 = vpop.permute.xlu0 %270  ;;  %v251_v9 = vsel %vm249_vm1, %v246_v52, %v248_v55 }
 0x111   : > { %v255_v18 = vadd.f32 %v251_v9, %v232_v12 }
 0x113   : > { %v269_v57 = vpop.permute.xlu1 %268 }
 0x114   : > { %v292_v58 = vpop.permute.xlu0 %291  ;;  %v273_v15 = vsel %vm272_vm2, %v267_v54, %v269_v57  ;;  %v274_v16 = vsel %vm272_vm2, %v269_v57, %v271_v56  ;;  %v447_v54 = vsub.s32 3, %v400_v38 }
 0x115   : > { %v277_v13 = vadd.f32 %v273_v15, %v254_v17  ;;  %v278_v20 = vadd.f32 %v274_v16, %v255_v18 }
 0x117   : > { %v290_v59 = vpop.permute.xlu1 %289 }
 0x118   : > { %v313_v60 = vpop.permute.xlu0 %312  ;;  %v296_v11 = vsel %vm295_vm3, %v290_v59, %v292_v58 }
 0x119   : > { %v300_v25 = vadd.f32 %v296_v11, %v277_v13 }
 0x11b   : > { %v294_v61 = vpop.permute.xlu1 %293 }
 0x11c   : > { %v317_v62 = vpop.permute.xlu0 %316  ;;  %v297_v19 = vsel %vm295_vm3, %v292_v58, %v294_v61 }
 0x11d   : > { %v301_v26 = vadd.f32 %v297_v19, %v278_v20 }
 0x11f   : > { %v315_v63 = vpop.permute.xlu1 %314 }
 0x120   : > { %v338_v0 = vpop.permute.xlu0 %337  ;;  %v319_v23 = vsel %vm318_vm4, %v313_v60, %v315_v63  ;;  %v320_v24 = vsel %vm318_vm4, %v315_v63, %v317_v62 }
 0x121   : > { %v323_v30 = vadd.f32 %v319_v23, %v300_v25  ;;  %v324_v31 = vadd.f32 %v320_v24, %v301_v26 }
 0x123   : > { %v336_v1 = vpop.permute.xlu1 %335 }
 0x124   : > { %v359_v7 = vpop.permute.xlu0 %358  ;;  %v342_v28 = vsel %vm341_vm5, %v336_v1, %v338_v0 }
 0x125   : > { %v346_v35 = vadd.f32 %v342_v28, %v323_v30 }
 0x127   : > { %v340_v4 = vpop.permute.xlu1 %339 }
 0x128   : > { %v363_v21 = vpop.permute.xlu0 %362  ;;  %v343_v29 = vsel %vm341_vm5, %v338_v0, %v340_v4 }
 0x129   : > { %v347_v36 = vadd.f32 %v343_v29, %v324_v31 }
 0x12b   : > { %v361_v14 = vpop.permute.xlu1 %360 }
 0x12c   : > { %v365_v33 = vsel %vm364_vm6, %v359_v7, %v361_v14  ;;  %v366_v34 = vsel %vm364_vm6, %v361_v14, %v363_v21  ;;  %v386_v37 = vpop.permute.xlu0 %385 }
 0x12d   : > { %v369_v41 = vadd.f32 %v365_v33, %v346_v35  ;;  %v370_v42 = vadd.f32 %v366_v34, %v347_v36 }
 0x12f   : > { %v382_v22 = vpop.permute.xlu1 %381 }
 0x133   : > { %v384_v32 = vpop.permute.xlu1 %383 }
 0x134   : > { %v388_v39 = vsel %vm387_vm7, %v382_v22, %v384_v32  ;;  %v389_v40 = vsel %vm387_vm7, %v384_v32, %v386_v37 }
 0x135   : > { %v392_v43 = vadd.f32 %v388_v39, %v369_v41  ;;  %v393_v44 = vadd.f32 %v389_v40, %v370_v42 }
 0x137   : > { %v402_v49 = vrot.slane %v392_v43, %v401_v45  ;;  %v416_v50 = vrot.slane %v392_v43, %v415_v46  ;;  %v406_v51 = vrot.slane %v393_v44, %v401_v45  ;;  %v420_v52 = vrot.slane %v393_v44, %v415_v46 }
 0x138   : > { %v432_v59 = vrot.slane %v392_v43, %v431_v53  ;;  %v436_v60 = vrot.slane %v393_v44, %v431_v53  ;;  %v448_v62 = vrot.slane %v392_v43, %v447_v54  ;;  %v452_v63 = vrot.slane %v393_v44, %v447_v54 }
 0x139   : > { %v407_v55 = vmul.f32 %v402_v49, %v827_v47  ;;  %v421_v56 = vmul.f32 %v416_v50, %v829_v48  ;;  %v408_v57 = vmul.f32 %v406_v51, %v827_v47  ;;  %v422_v58 = vmul.f32 %v420_v52, %v829_v48 }
 0x13b   : > { %v423_v1 = vadd.f32 %v421_v56, %v407_v55  ;;  %v424_v2 = vadd.f32 %v422_v58, %v408_v57 }
 0x13d   : > { %v443_v61 = vpop.permute.xlu0 %442 }
 0x13e   : > { %v453_v5 = vmul.f32 %v448_v62, %v443_v61  ;;  %v454_v6 = vmul.f32 %v452_v63, %v443_v61 }
 0x144   : > { %v427_v0 = vpop.permute.xlu1 %426 }
 0x145   : > { %v437_v3 = vmul.f32 %v432_v59, %v427_v0  ;;  %v438_v4 = vmul.f32 %v436_v60, %v427_v0 }
 0x147   : > { %v439_v7 = vadd.f32 %v437_v3, %v423_v1  ;;  %v440_v47 = vadd.f32 %v438_v4, %v424_v2 }
 0x149   : > { %v455_v48 = vadd.f32 %v453_v5, %v439_v7  ;;  %v460_v8 = vpop.permute.xlu1 %459  ;;  %v456_v9 = vadd.f32 %v454_v6, %v440_v47 }
 0x14b   : > { %v462_v10 = vadd.f32 %v460_v8, %v455_v48  ;;  %v463_v12 = vadd.f32 %v460_v8, %v456_v9 }
 0x14d   : > { %464 = vst [vmem:[%s190_s6] sm:$0xff] %v462_v10  ;;  %465 = vst [vmem:[%s190_s6 + $0x8] sm:$0xff] %v463_v12 }
 0x14e   : > { %639 = shalt.err (!%p636_p3)
}
 0x14f   : > { %s640_s20 = scalar_lea.hbm %s844_s10, 256  ;;  %s644_s27 = scalar_lea.hbm %s892_s4, 512 }
 0x150   : > { %p641_p4 = scmp.ne.s32.totalorder %s844_s10, %s640_s20  ;;  %p645_p9 = scmp.lt.u32.totalorder %s844_s10, %s892_s4 }
 0x151   : > { %p646_p10 = scmp.lt.u32.totalorder %s644_s27, %s640_s20  ;;  %p648_p12 = scmp.lt.u32.totalorder %s640_s20, %s844_s10 }
 0x152   : > { %p642_p7 = pnand %p641_p4, %p771_p5 }
 0x153   : > { %p647_p11 = por %p646_p10, %p645_p9 }
 0x154   : > { %p643_p8 = pneg %p642_p7 }
 0x155   : > { %p649_p13 = por %p648_p12, %p647_p11 }
 0x157   : > { %p650_p0 = pnand %p649_p13, %p643_p8 }
 0x159   : > { %653 = shalt.err (!%p650_p0)
}
 0x15a   : > { %554 = dma.vmem_to_hbm [thread:$0]  (%p771_p5), %s846_s7, 256, %s844_s10, %s467_s19  }
 0x15b PF: > { %p560_p1 = scmp.ge.s32.totalorder %s688_s18, 2  ;;  %s493_s30 = sand.u32 1, %s676_s15  }
 0x15c   : > { %s494_s5 = scalar_lea.sflag [#allocation3], %s493_s30 }
 0x15d   : > { %p557_p2 = pnand %p560_p1, %p775_p6 }
 0x15f   : > { %671 = dma.done.wait (!%p557_p2), %s494_s5, 256  }
 0x160   : > { %673 = vsyncadd (!%p557_p2), %s494_s5, 4294967040  ;;  %p14_p3 = scmp.ge.s32.totalorder %s758_s21, 4   ;;  %s895_s15 = smov %s680_s16 }
 0x161   : > { %s896_s16 = smov %s684_s17  ;;  %s897_s17 = smov %s769_s24 }
 0x162   : > { %s898_s18 = smov %s758_s21  ;;  %16 = sbr.rel (!%p14_p3) target bundleno = 3 (0x3), region = 71 }
 0x169   :  { %499 = vsyncpa [#allocation3], 1 }
 0x16a   :  { %501 = vsyncpa [#allocation3 + $0x1], 1 }

</bundles_post_ra>
